<compile_context>
chip_gen: v6e
topology: v6e:2x2x1
jax: 0.10.0
libtpu: 0.0.40
codegen_flags: <defaults>
</compile_context>

<pallas_src>
import jax
import jax.numpy as jnp
from jax.experimental import pallas as pl
from jax.experimental.pallas import tpu as pltpu

EMBEDDING_DIM = 5
VOCAB = ['the', 'cat', 'dog', 'in', 'hat']
VOCAB_SIZE = len(VOCAB)


def glove_kernel(i_ref, j_ref, w_ref, u_ref, out_ref):
    """i_ref/j_ref: SMEM (B,) int32; w_ref/u_ref: VMEM (V,D) f32; out_ref: VMEM (1,B) f32."""
    nb = out_ref.shape[1]

    # Scalar-indexed row gathers fused with the elementwise product:
    # each index is a scalar SMEM read, each row a dynamic (1, D) sublane
    # slice of the resident VMEM table.  B is small and static, so the
    # Python loop fully unrolls at trace time.
    prods = jnp.concatenate(
        [w_ref[pl.ds(i_ref[k], 1), :] * u_ref[pl.ds(j_ref[k], 1), :]
         for k in range(nb)],
        axis=0)                                   # (B, D) f32

    # Row-wise reduction over the embedding dim (cross-lane reduce, XLU).
    dots = jnp.sum(prods, axis=1)                 # (B,)

    # Single lane-dense store: batch lives on the lane axis.
    out_ref[...] = dots.reshape(1, nb)            # (1, B)


def glove_forward(i, j, W, U):
    """Pallas-backed equivalent of GloVe.forward(i, j) -> (B,) f32."""
    b = i.shape[0]
    out = pl.pallas_call(
        glove_kernel,
        out_shape=jax.ShapeDtypeStruct((1, b), jnp.float32),
        in_specs=[
            pl.BlockSpec(memory_space=pltpu.MemorySpace.SMEM),   # i indices (scalar path)
            pl.BlockSpec(memory_space=pltpu.MemorySpace.SMEM),   # j indices (scalar path)
            pl.BlockSpec(memory_space=pltpu.MemorySpace.VMEM),   # W table (tiny -> resident)
            pl.BlockSpec(memory_space=pltpu.MemorySpace.VMEM),   # U table (tiny -> resident)
        ],
        out_specs=pl.BlockSpec(memory_space=pltpu.MemorySpace.VMEM),
    )(i.astype(jnp.int32), j.astype(jnp.int32), W.astype(jnp.float32),
      U.astype(jnp.float32))
    return out[0, :]


if __name__ == "__main__":
    key = jax.random.PRNGKey(0)
    kw, ku = jax.random.split(key)
    # nn.Embedding default init is N(0, 1); reproduce deterministically.
    W = jax.random.normal(kw, (VOCAB_SIZE, EMBEDDING_DIM), dtype=jnp.float32)
    U = jax.random.normal(ku, (VOCAB_SIZE, EMBEDDING_DIM), dtype=jnp.float32)

    # Small batch of (center, context) index pairs.
    i = jnp.array([0, 1, 2, 3, 4, 1, 2, 0], dtype=jnp.int32)
    j = jnp.array([1, 0, 4, 2, 3, 3, 1, 4], dtype=jnp.int32)

    out = jax.block_until_ready(glove_forward(i, j, W, U))

    # Pure-JAX reference of the PyTorch forward.
    ref = jnp.sum(W[i] * U[j], axis=1)
    assert out.shape == (i.shape[0],)
    assert jnp.allclose(out, ref, atol=1e-5), (out, ref)

    print("KERNEL_OK")
</pallas_src>

<mosaic_0001>
module attributes {stable_mosaic.version = 11 : i64} {
  func.func @glove_kernel(%arg0: memref<8xi32, #tpu.memory_space<smem>>, %arg1: memref<8xi32, #tpu.memory_space<smem>>, %arg2: memref<5x5xf32, #tpu.memory_space<vmem>>, %arg3: memref<5x5xf32, #tpu.memory_space<vmem>>, %arg4: memref<1x8xf32, #tpu.memory_space<vmem>>) attributes {dimension_semantics = [], scalar_prefetch = 0 : i64, scratch_operands = 0 : i64, tpu.core_type = #tpu.core_type<tc>} {
    %c0 = arith.constant 0 : index
    %0 = memref.load %arg0[%c0] : memref<8xi32, #tpu.memory_space<smem>>
    %1 = arith.index_cast %0 : i32 to index
    %c0_0 = arith.constant 0 : index
    %2 = vector.load %arg2[%1, %c0_0] : memref<5x5xf32, #tpu.memory_space<vmem>>, vector<1x5xf32>
    %c0_1 = arith.constant 0 : index
    %3 = memref.load %arg1[%c0_1] : memref<8xi32, #tpu.memory_space<smem>>
    %4 = arith.index_cast %3 : i32 to index
    %c0_2 = arith.constant 0 : index
    %5 = vector.load %arg3[%4, %c0_2] : memref<5x5xf32, #tpu.memory_space<vmem>>, vector<1x5xf32>
    %6 = arith.mulf %2, %5 : vector<1x5xf32>
    %c1 = arith.constant 1 : index
    %7 = memref.load %arg0[%c1] : memref<8xi32, #tpu.memory_space<smem>>
    %8 = arith.index_cast %7 : i32 to index
    %c0_3 = arith.constant 0 : index
    %9 = vector.load %arg2[%8, %c0_3] : memref<5x5xf32, #tpu.memory_space<vmem>>, vector<1x5xf32>
    %c1_4 = arith.constant 1 : index
    %10 = memref.load %arg1[%c1_4] : memref<8xi32, #tpu.memory_space<smem>>
    %11 = arith.index_cast %10 : i32 to index
    %c0_5 = arith.constant 0 : index
    %12 = vector.load %arg3[%11, %c0_5] : memref<5x5xf32, #tpu.memory_space<vmem>>, vector<1x5xf32>
    %13 = arith.mulf %9, %12 : vector<1x5xf32>
    %c2 = arith.constant 2 : index
    %14 = memref.load %arg0[%c2] : memref<8xi32, #tpu.memory_space<smem>>
    %15 = arith.index_cast %14 : i32 to index
    %c0_6 = arith.constant 0 : index
    %16 = vector.load %arg2[%15, %c0_6] : memref<5x5xf32, #tpu.memory_space<vmem>>, vector<1x5xf32>
    %c2_7 = arith.constant 2 : index
    %17 = memref.load %arg1[%c2_7] : memref<8xi32, #tpu.memory_space<smem>>
    %18 = arith.index_cast %17 : i32 to index
    %c0_8 = arith.constant 0 : index
    %19 = vector.load %arg3[%18, %c0_8] : memref<5x5xf32, #tpu.memory_space<vmem>>, vector<1x5xf32>
    %20 = arith.mulf %16, %19 : vector<1x5xf32>
    %c3 = arith.constant 3 : index
    %21 = memref.load %arg0[%c3] : memref<8xi32, #tpu.memory_space<smem>>
    %22 = arith.index_cast %21 : i32 to index
    %c0_9 = arith.constant 0 : index
    %23 = vector.load %arg2[%22, %c0_9] : memref<5x5xf32, #tpu.memory_space<vmem>>, vector<1x5xf32>
    %c3_10 = arith.constant 3 : index
    %24 = memref.load %arg1[%c3_10] : memref<8xi32, #tpu.memory_space<smem>>
    %25 = arith.index_cast %24 : i32 to index
    %c0_11 = arith.constant 0 : index
    %26 = vector.load %arg3[%25, %c0_11] : memref<5x5xf32, #tpu.memory_space<vmem>>, vector<1x5xf32>
    %27 = arith.mulf %23, %26 : vector<1x5xf32>
    %c4 = arith.constant 4 : index
    %28 = memref.load %arg0[%c4] : memref<8xi32, #tpu.memory_space<smem>>
    %29 = arith.index_cast %28 : i32 to index
    %c0_12 = arith.constant 0 : index
    %30 = vector.load %arg2[%29, %c0_12] : memref<5x5xf32, #tpu.memory_space<vmem>>, vector<1x5xf32>
    %c4_13 = arith.constant 4 : index
    %31 = memref.load %arg1[%c4_13] : memref<8xi32, #tpu.memory_space<smem>>
    %32 = arith.index_cast %31 : i32 to index
    %c0_14 = arith.constant 0 : index
    %33 = vector.load %arg3[%32, %c0_14] : memref<5x5xf32, #tpu.memory_space<vmem>>, vector<1x5xf32>
    %34 = arith.mulf %30, %33 : vector<1x5xf32>
    %c5 = arith.constant 5 : index
    %35 = memref.load %arg0[%c5] : memref<8xi32, #tpu.memory_space<smem>>
    %36 = arith.index_cast %35 : i32 to index
    %c0_15 = arith.constant 0 : index
    %37 = vector.load %arg2[%36, %c0_15] : memref<5x5xf32, #tpu.memory_space<vmem>>, vector<1x5xf32>
    %c5_16 = arith.constant 5 : index
    %38 = memref.load %arg1[%c5_16] : memref<8xi32, #tpu.memory_space<smem>>
    %39 = arith.index_cast %38 : i32 to index
    %c0_17 = arith.constant 0 : index
    %40 = vector.load %arg3[%39, %c0_17] : memref<5x5xf32, #tpu.memory_space<vmem>>, vector<1x5xf32>
    %41 = arith.mulf %37, %40 : vector<1x5xf32>
    %c6 = arith.constant 6 : index
    %42 = memref.load %arg0[%c6] : memref<8xi32, #tpu.memory_space<smem>>
    %43 = arith.index_cast %42 : i32 to index
    %c0_18 = arith.constant 0 : index
    %44 = vector.load %arg2[%43, %c0_18] : memref<5x5xf32, #tpu.memory_space<vmem>>, vector<1x5xf32>
    %c6_19 = arith.constant 6 : index
    %45 = memref.load %arg1[%c6_19] : memref<8xi32, #tpu.memory_space<smem>>
    %46 = arith.index_cast %45 : i32 to index
    %c0_20 = arith.constant 0 : index
    %47 = vector.load %arg3[%46, %c0_20] : memref<5x5xf32, #tpu.memory_space<vmem>>, vector<1x5xf32>
    %48 = arith.mulf %44, %47 : vector<1x5xf32>
    %c7 = arith.constant 7 : index
    %49 = memref.load %arg0[%c7] : memref<8xi32, #tpu.memory_space<smem>>
    %50 = arith.index_cast %49 : i32 to index
    %c0_21 = arith.constant 0 : index
    %51 = vector.load %arg2[%50, %c0_21] : memref<5x5xf32, #tpu.memory_space<vmem>>, vector<1x5xf32>
    %c7_22 = arith.constant 7 : index
    %52 = memref.load %arg1[%c7_22] : memref<8xi32, #tpu.memory_space<smem>>
    %53 = arith.index_cast %52 : i32 to index
    %c0_23 = arith.constant 0 : index
    %54 = vector.load %arg3[%53, %c0_23] : memref<5x5xf32, #tpu.memory_space<vmem>>, vector<1x5xf32>
    %55 = arith.mulf %51, %54 : vector<1x5xf32>
    %56 = tpu.concatenate %6, %13, %20, %27, %34, %41, %48, %55 in 0 : vector<1x5xf32>, vector<1x5xf32>, vector<1x5xf32>, vector<1x5xf32>, vector<1x5xf32>, vector<1x5xf32>, vector<1x5xf32>, vector<1x5xf32> -> vector<8x5xf32>
    %cst = arith.constant dense<0.000000e+00> : vector<8xf32>
    %57 = vector.multi_reduction <add>, %56, %cst [1] : vector<8x5xf32> to vector<8xf32>
    %58 = vector.shape_cast %57 : vector<8xf32> to vector<1x8xf32>
    %c0_24 = arith.constant 0 : index
    %c0_25 = arith.constant 0 : index
    %59 = vector.load %arg4[%c0_24, %c0_25] : memref<1x8xf32, #tpu.memory_space<vmem>>, vector<1x8xf32>
    tpu.vector_store %arg4[%c0_24, %c0_25], %58 {strides = array<i32>} : memref<1x8xf32, #tpu.memory_space<vmem>>, vector<1x8xf32>,
    return
  }
}

</mosaic_0001>

<bundles_post_ra>
// kernel: tpu_custom_call.1
= control target key start
LH: loop header
LB: loop body
LE: loop exit
PB: predicated region body
PF: predicated region fallthrough
CT: control target
= control target key end

     0   :  { %9 = vsyncpa [#allocation5], 0  ;;  %s376_s0 = inlined_call_operand.hbm [shape: s32[8], index: 0, kind: input, shape index: {}]   ;;  %s377_s1 = inlined_call_operand.vmem [shape: s32[8], index: 1, kind: input, shape index: {}]   ;;  %s378_s2 = inlined_call_operand.hbm [shape: f32[5,5], index: 2, kind: input, shape index: {}]   ;;  %s379_s3 = inlined_call_operand.hbm [shape: f32[5,5], index: 3, kind: input, shape index: {}]   ;;  %s380_s4 = inlined_call_operand.hbm [shape: f32[1,8], index: 4, kind: output, shape index: {}]  }
   0x1   :  { %10 = vsyncpa [#allocation6], 0 }
   0x2   :  { %11 = vsyncpa [#allocation3], 0 }
   0x3   :  { %12 = vsyncpa [#allocation10], 0 }
   0x4   :  { %13 = vsyncpa [#allocation4], 0  ;;  %s28_s17 = sshll.u32 %s377_s1, 4  ;;  %s313_s18 = smov [#allocation2]   ;;  %s29_s17 = int_to_ptr.vmem [resolvable:$true] %s28_s17 }
   0x5   :  { %21 = dma.hbm_to_smem %s376_s0, 16, %s313_s18, [#allocation5]  }
   0x6   :  { %s231_s21 = scalar_lea.vmem %s29_s17, 16  ;;  %p236_p1 = scmp.lt.s32.totalorder %s29_s17, %s29_s17 }
   0x7   :  { %p232_p0 = scmp.ne.s32.totalorder %s29_s17, %s231_s21  ;;  %p237_p2 = scmp.lt.s32.totalorder %s231_s21, %s231_s21 }
   0x9   :  { %p238_p3 = por %p237_p2, %p236_p1 }
   0xb   :  { %p239_p4 = pnand %p238_p3, %p232_p0 }
   0xd   :  { %242 = shalt.err (!%p239_p4)
}
   0xe   :  { %s314_s22 = smov [#allocation7]   ;;  %s315_s23 = smov [#allocation8]  }
   0xf   :  { %31 = dma.vmem_to_smem %s29_s17, 16, %s314_s22, [#allocation6]  }
  0x10   :  { %s38_s24 = sshll.u32 %s315_s23, 4  ;;  %s316_s25 = smov [#allocation9]   ;;  %s39_s24 = int_to_ptr.vmem [resolvable:$true] %s38_s24 }
  0x11   :  { %s48_s26 = sshll.u32 %s316_s25, 4  ;;  %s251_s1 = scalar_lea.vmem %s39_s24, 128  ;;  %s49_s26 = int_to_ptr.vmem [resolvable:$true] %s48_s26 }
  0x12   :  { %p252_p5 = scmp.ne.s32.totalorder %s39_s24, %s251_s1  ;;  %p256_p6 = scmp.lt.s32.totalorder %s39_s24, %s39_s24 }
  0x13   :  { %p257_p7 = scmp.lt.s32.totalorder %s251_s1, %s251_s1 }
  0x15   :  { %p258_p8 = por %p257_p7, %p256_p6 }
  0x17   :  { %p259_p9 = pnand %p258_p8, %p252_p5 }
  0x19   :  { %262 = shalt.err (!%p259_p9)
}
  0x1a   :  { %41 = dma.hbm_to_vmem [thread:$0]  %s378_s2, 128, %s39_s24, [#allocation3]  }
  0x1b   :  { %s271_s28 = scalar_lea.vmem %s49_s26, 128  ;;  %p276_p11 = scmp.lt.s32.totalorder %s49_s26, %s49_s26 }
  0x1c   :  { %p272_p10 = scmp.ne.s32.totalorder %s49_s26, %s271_s28  ;;  %p277_p12 = scmp.lt.s32.totalorder %s271_s28, %s271_s28 }
  0x1e   :  { %p278_p13 = por %p277_p12, %p276_p11 }
  0x20   :  { %p279_p0 = pnand %p278_p13, %p272_p10 }
  0x22   :  { %282 = shalt.err (!%p279_p0)
}
  0x23   :  { %51 = dma.hbm_to_vmem [thread:$0]  %s379_s3, 128, %s49_s26, [#allocation10]  }
  0x24   :  { %303 = dma.done.wait [#allocation5], 16  }
  0x25   :  { %304 = vsyncadd [#allocation5], 4294967280 }
  0x26   :  { %305 = dma.done.wait [#allocation6], 16  }
  0x27   :  { %306 = vsyncadd [#allocation6], 4294967280 }
  0x28   :  { %307 = dma.done.wait [#allocation3], 128  }
  0x29   :  { %308 = vsyncadd [#allocation3], 4294967168 }
  0x2a   :  { %309 = dma.done.wait [#allocation10], 128  }
  0x2b   :  { %310 = vsyncadd [#allocation10], 4294967168 }
  0x2c   :  { %64 = sfence }
  0x2d   :  { %s65_s2 = sld [smem:[#allocation2]]  ;;  %vm142_vm0 = vcmask 1040384   ;;  %vm144_vm1 = vcmask 1041408   ;;  %vm146_vm2 = vcmask 1042432   ;;  %vm148_vm3 = vcmask 1043456  }
  0x2e   :  { %s68_s5 = sld [smem:[#allocation7]]  ;;  %vm150_vm4 = vcmask 1044480   ;;  %vm152_vm5 = vcmask 1045504   ;;  %vm154_vm6 = vcmask 1046528   ;;  %vm156_vm7 = vcmask 39936  }
  0x2f   :  { %s204_s6 = sld [smem:[#allocation2 + $0x1]]  ;;  %v161_v39 = vlaneseq  ;;  %vm168_vm8 = vcmask 57344  }
  0x30   :  { %s205_s7 = sld [smem:[#allocation7 + $0x1]] }
  0x31   :  { %s206_s8 = sld [smem:[#allocation2 + $0x2]]  ;;  %v162_v40 = vand.u32 127, %v161_v39  ;;  %v164_v41 = vshrl.u32 %v161_v39, 7 }
  0x32   :  { %s207_s9 = sld [smem:[#allocation7 + $0x2]] }
  0x33   :  { %s208_s10 = sld [smem:[#allocation2 + $0x3]]  ;;  %s66_s11 = scalar_lea.vmem [#allocation8], %s65_s2  ;;  %v165_v42 = vsub.s32 %v162_v40, %v164_v41 }
  0x34   :  { %v67_v0 = vld [vmem:[%s66_s11] sm:$0x1]  ;;  %s209_s12 = sld [smem:[#allocation7 + $0x3]]  ;;  %s69_s3 = scalar_lea.vmem [#allocation9], %s68_s5 }
  0x35   :  { %v70_v1 = vld [vmem:[%s69_s3] sm:$0x1]  ;;  %s210_s13 = sld [smem:[#allocation2 + $0x4]]  ;;  %s73_s14 = scalar_lea.vmem [#allocation8], %s204_s6 }
  0x36   :  { %v74_v2 = vld [vmem:[%s73_s14] sm:$0x1]  ;;  %s355_s15 = sld [smem:[#allocation7 + $0x4]]  ;;  %s76_s16 = scalar_lea.vmem [#allocation9], %s205_s7  ;;  %v71_v4 = vmul.f32 %v70_v1, %v67_v0 }
  0x37   :  { %v77_v3 = vld [vmem:[%s76_s16] sm:$0x1]  ;;  %s357_s17 = sld [smem:[#allocation2 + $0x5]]  ;;  %s80_s18 = scalar_lea.vmem [#allocation8], %s206_s8 }
  0x38   :  { %v78_v5 = vmul.f32 %v77_v3, %v74_v2  ;;  %v81_v6 = vld [vmem:[%s80_s18] sm:$0x1]  ;;  %s359_s19 = sld [smem:[#allocation7 + $0x5]]  ;;  %s83_s20 = scalar_lea.vmem [#allocation9], %s207_s9 }
  0x39   :  { %v84_v7 = vld [vmem:[%s83_s20] sm:$0x1]  ;;  %s361_s21 = sld [smem:[#allocation2 + $0x6]]  ;;  %s87_s22 = scalar_lea.vmem [#allocation8], %s208_s10 }
  0x3a   :  { %v85_v8 = vmul.f32 %v84_v7, %v81_v6  ;;  %v88_v9 = vld [vmem:[%s87_s22] sm:$0x1]  ;;  %s363_s23 = sld [smem:[#allocation7 + $0x6]]  ;;  %v122_v10 = vrot.slane %v78_v5, 7  ;;  %s90_s24 = scalar_lea.vmem [#allocation9], %s209_s12 }
  0x3b   :  { %v91_v11 = vld [vmem:[%s90_s24] sm:$0x1]  ;;  %s365_s25 = sld [smem:[#allocation2 + $0x7]]  ;;  %s94_s26 = scalar_lea.vmem [#allocation8], %s210_s13 }
  0x3c   :  { %v92_v12 = vmul.f32 %v91_v11, %v88_v9  ;;  %v95_v13 = vld [vmem:[%s94_s26] sm:$0x1]  ;;  %s217_s1 = sld [smem:[#allocation7 + $0x7]]  ;;  %v125_v14 = vrot.slane %v85_v8, 6  ;;  %v143_v15 = vsel %vm142_vm0, %v71_v4, %v122_v10  ;;  %s97_s0 = scalar_lea.vmem [#allocation9], %s355_s15 }
  0x3d   :  { %v98_v16 = vld [vmem:[%s97_s0] sm:$0x1]  ;;  %s101_s27 = scalar_lea.vmem [#allocation8], %s357_s17  ;;  %s317_s6 = smov [#allocation11]  }
  0x3e   :  { %v99_v17 = vmul.f32 %v98_v16, %v95_v13  ;;  %v102_v18 = vld [vmem:[%s101_s27] sm:$0x1]  ;;  %v128_v19 = vrot.slane %v92_v12, 5  ;;  %v145_v20 = vsel %vm144_vm1, %v143_v15, %v125_v14  ;;  %s104_s28 = scalar_lea.vmem [#allocation9], %s359_s19  ;;  %s176_s7 = sshll.u32 %s317_s6, 4  ;;  %s177_s7 = int_to_ptr.vmem [resolvable:$true] %s176_s7 }
  0x3f   :  { %v105_v21 = vld [vmem:[%s104_s28] sm:$0x1]  ;;  %s108_s29 = scalar_lea.vmem [#allocation8], %s361_s21  ;;  %s283_s8 = scalar_lea.vmem %s177_s7, 16 }
  0x40   :  { %v106_v22 = vmul.f32 %v105_v21, %v102_v18  ;;  %v109_v23 = vld [vmem:[%s108_s29] sm:$0x1]  ;;  %v131_v24 = vrot.slane %v99_v17, 4  ;;  %v147_v25 = vsel %vm146_vm2, %v145_v20, %v128_v19  ;;  %s111_s30 = scalar_lea.vmem [#allocation9], %s363_s23  ;;  %p284_p1 = scmp.ne.s32.totalorder %s177_s7, %s283_s8 }
  0x41   :  { %v112_v26 = vld [vmem:[%s111_s30] sm:$0x1]  ;;  %s115_s2 = scalar_lea.vmem [#allocation8], %s365_s25  ;;  %s287_s9 = scalar_lea.vmem %s177_s7, 32 }
  0x42   :  { %v113_v27 = vmul.f32 %v112_v26, %v109_v23  ;;  %v116_v28 = vld [vmem:[%s115_s2] sm:$0x1]  ;;  %v134_v29 = vrot.slane %v106_v22, 3  ;;  %v149_v30 = vsel %vm148_vm3, %v147_v25, %v131_v24  ;;  %s118_s5 = scalar_lea.vmem [#allocation9], %s217_s1  ;;  %p288_p2 = scmp.lt.s32.totalorder %s177_s7, %s177_s7 }
  0x43   :  { %v119_v31 = vld [vmem:[%s118_s5] sm:$0x1]  ;;  %p289_p3 = scmp.lt.s32.totalorder %s287_s9, %s283_s8 }
  0x44   :  { %v120_v32 = vmul.f32 %v119_v31, %v116_v28  ;;  %v137_v33 = vrot.slane %v113_v27, 2  ;;  %v151_v34 = vsel %vm150_vm4, %v149_v30, %v134_v29 }
  0x45   :  { %p290_p4 = por %p289_p3, %p288_p2 }
  0x46   :  { %v140_v35 = vrot.slane %v120_v32, 1  ;;  %v153_v36 = vsel %vm152_vm5, %v151_v34, %v137_v33 }
  0x47   :  { %p291_p5 = pnand %p290_p4, %p284_p1 }
  0x48   :  { %v155_v37 = vsel %vm154_vm6, %v153_v36, %v140_v35 }
  0x49   :  { %v157_v38 = vsel %vm156_vm7, %v155_v37, 0.0 }
  0x4a   :  { %158 = vadd.xlane.f32.xlu0 %v157_v38 }
  0xd3   :  { %v159_v43 = vpop.xlane.xlu0 %158 }
  0xd4   :  { %v166_v44 = vrot.slane %v159_v43, %v165_v42 }
  0xd6   :  { %169 = vst.msk [vmem:[#allocation11] sm:$0x1] %vm168_vm8, %v166_v44 }
  0xd7   :  { %294 = shalt.err (!%p291_p5)
}
  0xd8   :  { %179 = dma.vmem_to_hbm [thread:$0]  %s177_s7, 16, %s380_s4, [#allocation4]  }
  0xd9   :  { %311 = dma.done.wait [#allocation4], 16  }
  0xda   :  { %312 = vsyncadd [#allocation4], 4294967280 }
  0xdb   :  { %183 = vsyncpa [#allocation3], 1 }
  0xdc   :  { %184 = vsyncpa [#allocation10], 1 }
  0xdd   :  { %185 = vsyncpa [#allocation4], 1 }
  0xde   :  { %186 = vsyncpa [#allocation5], 1 }
  0xdf   :  { %187 = vsyncpa [#allocation6], 1 }

</bundles_post_ra>
